<compile_context>
chip_gen: v7x
topology: tpu7x:2x2x1
jax: 0.10.0
libtpu: 0.0.40
codegen_flags: <defaults>
</compile_context>

<pallas_src>
import jax
import jax.numpy as jnp
from jax.experimental import pallas as pl
from jax.experimental.pallas import tpu as pltpu


def move_classifier_kernel(x_ref, w1t_ref, w2r_ref, o_ref):
    # Cast the streamed f32 X tile to bf16 right before the matmul: keeps the HBM
    # X stream to a single f32 pass while the MXU runs at native bf16 rate with
    # f32 accumulation (preferred_element_type).
    x = x_ref[...].astype(jnp.bfloat16)
    # Linear1 (bias=False): (TB, F) bf16 @ (F, H) bf16 -> (TB, H) f32 on the MXU.
    h = jnp.dot(x, w1t_ref[...], preferred_element_type=jnp.float32)
    # LeakyReLU (PyTorch default negative_slope = 0.01), VPU.
    h = jnp.where(h > 0, h, 0.01 * h)
    # Linear2 (bias=False, out_features=1): broadcast-multiply (VPU) + lane reduce
    # (XLU). Neither slot is the binding unit for this kernel.
    z = jnp.sum(h * w2r_ref[...], axis=-1, keepdims=True)  # (TB, H)*(1, H) -> (TB, 1)
    # Exact sigmoid: epilogue touches only TB elements per step, so no approx tricks.
    o_ref[...] = (1.0 / (1.0 + jnp.exp(-z))).astype(o_ref.dtype)


def _round_up(x, m):
    return (x + m - 1) // m * m


def _vmem_capacity_bytes():
    try:
        return int(pltpu.get_tpu_info().vmem_capacity_bytes)
    except Exception:
        return 64 * 1024 * 1024  # conservative (v7x-sized) fallback


def _pick_block_b(F):
    # Budget ~40% of physical VMEM for the double-buffered f32 X stream; the rest
    # covers the single-buffered bf16 W1.T, the (TB, H) f32 intermediate and slack.
    # At F=6400: v5e/v6e (128 MiB) -> TB ~ 1024; v7x (64 MiB) -> TB ~ 512.
    cap = _vmem_capacity_bytes()
    tb = int(0.4 * cap) // (2 * F * 4)
    return max(8, min(2048, (tb // 8) * 8))


def move_classifier(x, w1, w2, *, block_b=None):
    """Pallas forward of MoveClassifier.

    x:  (B, F) float32 activations
    w1: (H, F) float32  (PyTorch linear1.weight layout)
    w2: (1, H) float32  (PyTorch linear2.weight layout)
    returns (B, 1) float32
    """
    B, F = x.shape
    H, F2 = w1.shape
    assert F2 == F and w2.shape == (1, H)

    # Weight prep: one small HBM pass. For repeated inference with fixed weights,
    # precompute w1t/w2r once outside the per-call path.
    w1t = jnp.transpose(w1).astype(jnp.bfloat16)  # (F, H), MXU-friendly
    w2r = w2.astype(jnp.float32)                  # (1, H), tiny, stays f32

    # Batch tile: multiple of 8 sublanes, no padded copy of X. The ragged last
    # tile is clipped by Pallas; out-of-range rows never reach the kept output.
    auto = block_b is None
    if auto:
        block_b = _pick_block_b(F)
    tb = max(8, min(_round_up(block_b, 8), _round_up(B, 8)))
    if auto and pl.cdiv(B, tb) == 1 and B > 8:
        # v7x megacore: give both TensorCores at least one tile when possible.
        tb = max(8, _round_up(pl.cdiv(B, 2), 8))
    grid = (pl.cdiv(B, tb),)

    # Per-step VMEM estimate: double-buffered f32 X tile, single-buffered bf16
    # W1.T + f32 W2, (tb, H) f32 intermediate, double-buffered (tb, 1) output.
    est = 2 * tb * F * 4 + F * H * 2 + H * 4 + tb * H * 4 + 2 * tb * 4
    vmem_limit = int(min(max(1.25 * est + (2 << 20), 32 << 20),
                         0.75 * _vmem_capacity_bytes()))

    out_shape = jax.ShapeDtypeStruct((B, 1), jnp.float32)
    compiler_params = pltpu.CompilerParams(
        # Independent batch tiles -> megacore sharding on v7x (no-op on 1-TC chips).
        dimension_semantics=("parallel",),
        vmem_limit_bytes=vmem_limit,
    )

    def _build(single_buffer_weights):
        # Constant index_maps => weights DMA'd once and stay VMEM-resident across
        # grid steps; Buffered(1) additionally drops their unused second pipeline
        # buffer (~F*H*2 bytes saved, e.g. 6.25 MiB at the 6400x512 defaults).
        kw = {"pipeline_mode": pl.Buffered(1)} if single_buffer_weights else {}
        in_specs = [
            pl.BlockSpec((tb, F), lambda i: (i, 0)),        # X: streamed per tile
            pl.BlockSpec((F, H), lambda i: (0, 0), **kw),   # W1.T: resident
            pl.BlockSpec((1, H), lambda i: (0, 0), **kw),   # W2:   resident
        ]
        return pl.pallas_call(
            move_classifier_kernel,
            out_shape=out_shape,
            grid_spec=pl.GridSpec(
                grid=grid,
                in_specs=in_specs,
                out_specs=pl.BlockSpec((tb, 1), lambda i: (i, 0)),
            ),
            compiler_params=compiler_params,
        )

    try:
        return _build(True)(x, w1t, w2r)
    except Exception:
        # JAX build without BlockSpec pipeline_mode support: fall back to default
        # double-buffering (weights are still fetched only once thanks to the
        # constant index_map; only the spare buffer's VMEM is wasted).
        return _build(False)(x, w1t, w2r)


if __name__ == "__main__":
    # Small shapes consistent with the module's (B, num_features) -> (B, 1) forward.
    # B deliberately not a multiple of the tile to exercise the ragged last tile.
    B, F, H = 40, 512, 128

    key = jax.random.PRNGKey(0)
    kx, k1, k2 = jax.random.split(key, 3)

    x = jax.random.normal(kx, (B, F), dtype=jnp.float32)
    # Deterministic synthetic weights (PyTorch-style uniform(-1/sqrt(fan_in), +)).
    w1 = jax.random.uniform(k1, (H, F), dtype=jnp.float32,
                            minval=-1.0 / jnp.sqrt(F), maxval=1.0 / jnp.sqrt(F))
    w2 = jax.random.uniform(k2, (1, H), dtype=jnp.float32,
                            minval=-1.0 / jnp.sqrt(H), maxval=1.0 / jnp.sqrt(H))

    # Pure-JAX f32 reference (kernel uses bf16 MXU inputs -> loosened tolerance).
    h_ref = x @ w1.T
    h_ref = jnp.where(h_ref > 0, h_ref, 0.01 * h_ref)
    ref = jax.nn.sigmoid(h_ref @ w2.T)

    # 1) Small explicit tile: multi-step pipelined grid + ragged tail.
    out = move_classifier(x, w1, w2, block_b=16)
    jax.block_until_ready(out)
    assert out.shape == (B, 1)
    assert jnp.allclose(out, ref, atol=1e-2, rtol=1e-2), (
        float(jnp.max(jnp.abs(out - ref))))

    # 2) Auto (hardware-derived) tiling path.
    out_auto = move_classifier(x, w1, w2)
    jax.block_until_ready(out_auto)
    assert out_auto.shape == (B, 1)
    assert jnp.allclose(out_auto, ref, atol=1e-2, rtol=1e-2), (
        float(jnp.max(jnp.abs(out_auto - ref))))

    print("KERNEL_OK")
</pallas_src>

<mosaic_0001>
module attributes {stable_mosaic.version = 11 : i64} {
  func.func @move_classifier_kernel(%arg0: i32, %arg1: memref<16x512xf32, #tpu.memory_space<vmem>>, %arg2: memref<512x128xbf16, #tpu.memory_space<vmem>>, %arg3: memref<1x128xf32, #tpu.memory_space<vmem>>, %arg4: memref<16x1xf32, #tpu.memory_space<vmem>>) attributes {dimension_semantics = [#tpu.dimension_semantics<parallel>], iteration_bounds = array<i64: 3>, scalar_prefetch = 0 : i64, scratch_operands = 0 : i64, tpu.core_type = #tpu.core_type<tc>, window_params = [{transform_indices = @transform_0, window_bounds = array<i64: 16, 512>}, {pipeline_mode = #tpu.pipeline_mode<synchronous>, transform_indices = @transform_1, window_bounds = array<i64: 512, 128>}, {pipeline_mode = #tpu.pipeline_mode<synchronous>, transform_indices = @transform_2, window_bounds = array<i64: 1, 128>}, {transform_indices = @transform_3, window_bounds = array<i64: 16, 1>}]} {
    %c0 = arith.constant 0 : index
    %c0_0 = arith.constant 0 : index
    %0 = vector.load %arg1[%c0, %c0_0] : memref<16x512xf32, #tpu.memory_space<vmem>>, vector<16x512xf32>
    %1 = arith.truncf %0 : vector<16x512xf32> to vector<16x512xbf16>
    %c0_1 = arith.constant 0 : index
    %c0_2 = arith.constant 0 : index
    %2 = vector.load %arg2[%c0_1, %c0_2] : memref<512x128xbf16, #tpu.memory_space<vmem>>, vector<512x128xbf16>
    %cst = arith.constant dense<0.000000e+00> : vector<16x128xf32>
    %3 = tpu.matmul %1, %2, %cst {dimension_numbers = #tpu.dot_dimension_numbers<[1], [0], [0], [1], [0, 0, 1, 1], [], []>} : vector<16x512xbf16>, vector<512x128xbf16>, vector<16x128xf32> -> vector<16x128xf32>
    %cst_3 = arith.constant 0.000000e+00 : f32
    %4 = vector.broadcast %cst_3 : f32 to vector<16x128xf32>
    %5 = arith.cmpf ogt, %3, %4 : vector<16x128xf32>
    %cst_4 = arith.constant 0.00999999977 : f32
    %6 = vector.broadcast %cst_4 : f32 to vector<16x128xf32>
    %7 = arith.mulf %6, %3 : vector<16x128xf32>
    %8 = arith.select %5, %3, %7 : vector<16x128xi1>, vector<16x128xf32>
    %c0_5 = arith.constant 0 : index
    %c0_6 = arith.constant 0 : index
    %9 = vector.load %arg3[%c0_5, %c0_6] : memref<1x128xf32, #tpu.memory_space<vmem>>, vector<1x128xf32>
    %10 = vector.broadcast %9 : vector<1x128xf32> to vector<16x128xf32>
    %11 = arith.mulf %8, %10 : vector<16x128xf32>
    %cst_7 = arith.constant dense<0.000000e+00> : vector<16xf32>
    %12 = vector.multi_reduction <add>, %11, %cst_7 [1] : vector<16x128xf32> to vector<16xf32>
    %13 = vector.shape_cast %12 : vector<16xf32> to vector<16x1xf32>
    %cst_8 = arith.constant 0.000000e+00 : f32
    %14 = vector.broadcast %cst_8 : f32 to vector<16x1xf32>
    %15 = arith.subf %14, %13 : vector<16x1xf32>
    %16 = math.exp %15 : vector<16x1xf32>
    %cst_9 = arith.constant 1.000000e+00 : f32
    %17 = vector.broadcast %cst_9 : f32 to vector<16x1xf32>
    %18 = arith.addf %17, %16 : vector<16x1xf32>
    %cst_10 = arith.constant 1.000000e+00 : f32
    %19 = vector.broadcast %cst_10 : f32 to vector<16x1xf32>
    %20 = arith.divf %19, %18 : vector<16x1xf32>
    %c0_11 = arith.constant 0 : index
    %c0_12 = arith.constant 0 : index
    %21 = vector.load %arg4[%c0_11, %c0_12] : memref<16x1xf32, #tpu.memory_space<vmem>>, vector<16x1xf32>
    tpu.vector_store %arg4[%c0_11, %c0_12], %20 {strides = array<i32>} : memref<16x1xf32, #tpu.memory_space<vmem>>, vector<16x1xf32>,
    return
  }
  func.func @transform_0(%arg0: i32) -> (i32, i32) {
    %c0_i32 = arith.constant 0 : i32
    %c0_i32_0 = arith.constant 0 : i32
    return %arg0, %c0_i32 : i32, i32
  }
  func.func @transform_1(%arg0: i32) -> (i32, i32) {
    %c0_i32 = arith.constant 0 : i32
    %c0_i32_0 = arith.constant 0 : i32
    %c0_i32_1 = arith.constant 0 : i32
    return %c0_i32, %c0_i32_0 : i32, i32
  }
  func.func @transform_2(%arg0: i32) -> (i32, i32) {
    %c0_i32 = arith.constant 0 : i32
    %c0_i32_0 = arith.constant 0 : i32
    %c0_i32_1 = arith.constant 0 : i32
    return %c0_i32, %c0_i32_0 : i32, i32
  }
  func.func @transform_3(%arg0: i32) -> (i32, i32) {
    %c0_i32 = arith.constant 0 : i32
    %c0_i32_0 = arith.constant 0 : i32
    return %arg0, %c0_i32 : i32, i32
  }
}

module attributes {stable_mosaic.version = 11 : i64} {
  func.func @move_classifier_kernel(%arg0: i32, %arg1: memref<16x512xf32, #tpu.memory_space<vmem>>, %arg2: memref<512x128xbf16, #tpu.memory_space<vmem>>, %arg3: memref<1x128xf32, #tpu.memory_space<vmem>>, %arg4: memref<16x1xf32, #tpu.memory_space<vmem>>) attributes {dimension_semantics = [#tpu.dimension_semantics<parallel>], iteration_bounds = array<i64: 3>, scalar_prefetch = 0 : i64, scratch_operands = 0 : i64, tpu.core_type = #tpu.core_type<tc>, window_params = [{transform_indices = @transform_0, window_bounds = array<i64: 16, 512>}, {pipeline_mode = #tpu.pipeline_mode<synchronous>, transform_indices = @transform_1, window_bounds = array<i64: 512, 128>}, {pipeline_mode = #tpu.pipeline_mode<synchronous>, transform_indices = @transform_2, window_bounds = array<i64: 1, 128>}, {transform_indices = @transform_3, window_bounds = array<i64: 16, 1>}]} {
    %c0 = arith.constant 0 : index
    %c0_0 = arith.constant 0 : index
    %0 = vector.load %arg1[%c0, %c0_0] : memref<16x512xf32, #tpu.memory_space<vmem>>, vector<16x512xf32>
    %1 = arith.truncf %0 : vector<16x512xf32> to vector<16x512xbf16>
    %c0_1 = arith.constant 0 : index
    %c0_2 = arith.constant 0 : index
    %2 = vector.load %arg2[%c0_1, %c0_2] : memref<512x128xbf16, #tpu.memory_space<vmem>>, vector<512x128xbf16>
    %cst = arith.constant dense<0.000000e+00> : vector<16x128xf32>
    %3 = tpu.matmul %1, %2, %cst {dimension_numbers = #tpu.dot_dimension_numbers<[1], [0], [0], [1], [0, 0, 1, 1], [], []>} : vector<16x512xbf16>, vector<512x128xbf16>, vector<16x128xf32> -> vector<16x128xf32>
    %cst_3 = arith.constant 0.000000e+00 : f32
    %4 = vector.broadcast %cst_3 : f32 to vector<16x128xf32>
    %5 = arith.cmpf ogt, %3, %4 : vector<16x128xf32>
    %cst_4 = arith.constant 0.00999999977 : f32
    %6 = vector.broadcast %cst_4 : f32 to vector<16x128xf32>
    %7 = arith.mulf %6, %3 : vector<16x128xf32>
    %8 = arith.select %5, %3, %7 : vector<16x128xi1>, vector<16x128xf32>
    %c0_5 = arith.constant 0 : index
    %c0_6 = arith.constant 0 : index
    %9 = vector.load %arg3[%c0_5, %c0_6] : memref<1x128xf32, #tpu.memory_space<vmem>>, vector<1x128xf32>
    %10 = vector.broadcast %9 : vector<1x128xf32> to vector<16x128xf32>
    %11 = arith.mulf %8, %10 : vector<16x128xf32>
    %cst_7 = arith.constant dense<0.000000e+00> : vector<16xf32>
    %12 = vector.multi_reduction <add>, %11, %cst_7 [1] : vector<16x128xf32> to vector<16xf32>
    %13 = vector.shape_cast %12 : vector<16xf32> to vector<16x1xf32>
    %cst_8 = arith.constant 0.000000e+00 : f32
    %14 = vector.broadcast %cst_8 : f32 to vector<16x1xf32>
    %15 = arith.subf %14, %13 : vector<16x1xf32>
    %16 = math.exp %15 : vector<16x1xf32>
    %cst_9 = arith.constant 1.000000e+00 : f32
    %17 = vector.broadcast %cst_9 : f32 to vector<16x1xf32>
    %18 = arith.addf %17, %16 : vector<16x1xf32>
    %cst_10 = arith.constant 1.000000e+00 : f32
    %19 = vector.broadcast %cst_10 : f32 to vector<16x1xf32>
    %20 = arith.divf %19, %18 : vector<16x1xf32>
    %c0_11 = arith.constant 0 : index
    %c0_12 = arith.constant 0 : index
    %21 = vector.load %arg4[%c0_11, %c0_12] : memref<16x1xf32, #tpu.memory_space<vmem>>, vector<16x1xf32>
    tpu.vector_store %arg4[%c0_11, %c0_12], %20 {strides = array<i32>} : memref<16x1xf32, #tpu.memory_space<vmem>>, vector<16x1xf32>,
    return
  }
  func.func @transform_0(%arg0: i32) -> (i32, i32) {
    %c0_i32 = arith.constant 0 : i32
    %c0_i32_0 = arith.constant 0 : i32
    return %arg0, %c0_i32 : i32, i32
  }
  func.func @transform_1(%arg0: i32) -> (i32, i32) {
    %c0_i32 = arith.constant 0 : i32
    %c0_i32_0 = arith.constant 0 : i32
    %c0_i32_1 = arith.constant 0 : i32
    return %c0_i32, %c0_i32_0 : i32, i32
  }
  func.func @transform_2(%arg0: i32) -> (i32, i32) {
    %c0_i32 = arith.constant 0 : i32
    %c0_i32_0 = arith.constant 0 : i32
    %c0_i32_1 = arith.constant 0 : i32
    return %c0_i32, %c0_i32_0 : i32, i32
  }
  func.func @transform_3(%arg0: i32) -> (i32, i32) {
    %c0_i32 = arith.constant 0 : i32
    %c0_i32_0 = arith.constant 0 : i32
    return %arg0, %c0_i32 : i32, i32
  }
}

</mosaic_0001>

<bundles_post_ra>
// kernel: tpu_custom_call.1
= control target key start
LH: loop header
LB: loop body
LE: loop exit
PB: predicated region body
PF: predicated region fallthrough
CT: control target
= control target key end

     0   :  { %8 = vsyncpa [#allocation3], 0  ;;  %s1501_s0 = inlined_call_operand.hbm [shape: f32[40,512], index: 0, kind: input, shape index: {}]   ;;  %s1502_s1 = inlined_call_operand.hbm [shape: bf16[512,128], index: 1, kind: input, shape index: {}]   ;;  %s1503_s2 = inlined_call_operand.vmem [shape: f32[1,128], index: 2, kind: input, shape index: {}]   ;;  %s1504_s3 = inlined_call_operand.vmem [shape: f32[40,1], index: 3, kind: output, shape index: {}]  }
   0x1   :  { %10 = vsyncpa [#allocation3 + $0x1], 0 }
   0x2   :  { %11 = vsyncpa [#allocation5], 0  ;;  %s1299_s12 = smov 0   ;;  %s1301_s13 = smov 0  }
   0x3   :  { %s1303_s14 = smov 0   ;;  %s1305_s15 = smov 0  }
   0x4 LB: > { %s1318_s16 = sadd.s32 4294967295, %s1239_s15   ;;  %s1321_s17 = sadd.s32 1, %s1239_s15   ;;  %s1239_s15 = sphi %s1305_s15, %s1522_s15   ;;  %s1235_s14 = sphi %s1303_s14, %s1521_s14   ;;  %s1231_s13 = sphi %s1301_s13, %s1520_s13   ;;  %s1227_s12 = sphi %s1299_s12, %s1519_s12  }
   0x5   : > { %s21_s18 = ssub.s32 %s1239_s15, %s1321_s17  ;;  %s24_s19 = sadd.s32 1, %s1235_s14 }
   0x6   : > { %p22_p0 = scmp.eq.s32.totalorder %s21_s18, 0  ;;  %p31_p1 = scmp.ne.s32.totalorder %s1235_s14, %s1231_s13 }
   0x7   : > { %p32_p2 = scmp.eq.s32.totalorder %s1239_s15, 0  ;;  %p37_p3 = scmp.ne.s32.totalorder %s1231_s13, %s1227_s12 }
   0x8   : > { %s1331_s20 = scalar_select %p22_p0, %s1235_s14, %s24_s19  }
   0x9   : > { %p1333_p4 = por %p32_p2, %p31_p1  ;;  %p1505_p5 = scmp.eq.s32.totalorder %s1318_s16, 0 }
   0xa   : > { %p103_p6 = scmp.eq.s32.totalorder %s1318_s16, 2  ;;  %p845_p7 = scmp.ge.s32.totalorder %s1239_s15, 1 }
   0xb   : > { %s1508_s21 = scalar_select %p1333_p4, 1, 0 }
   0xc   : > { %p1342_p8 = por %p1505_p5, %p37_p3  ;;  %p116_p9 = scmp.lt.s32.totalorder %s1239_s15, 4 }
   0xd   : > { %p1347_p10 = por %p103_p6, %p31_p1  ;;  %s1273_s25 = smov [#allocation4]  }
   0xe   : > { %s1509_s22 = scalar_select %p1342_p8, 1, 0 }
   0xf   : > { %s1510_s23 = scalar_select %p1347_p10, 1, 0 }
  0x10   : > { %p1351_p11 = pnand %p845_p7, %p116_p9  ;;  %s128_s26 = sshll.u32 %s1273_s25, 4  ;;  %s129_s26 = int_to_ptr.vmem [resolvable:$true] %s128_s26 }
  0x11   : > { %s1113_s30 = scalar_lea.hbm %s1502_s1, 4096 }
  0x12   : > { %s1511_s24 = scalar_select %p1351_p11, 1, 0 }
  0x13   : > { %p966_p12 = pneg %p1351_p11  ;;  %p1114_p0 = scmp.ne.s32.totalorder %s1502_s1, %s1113_s30 }
  0x14   : > { %p1120_p6 = scmp.lt.u32.totalorder %s1113_s30, %s1502_s1 }
  0x15   : > { %p1359_p13 = pnand %p966_p12, %p1505_p5 }
  0x17   : > { %p1115_p1 = pneg %p1359_p13 }
  0x19   : > { %p1116_p2 = pnand %p1115_p1, %p1114_p0 }
  0x1b   : > { %p1117_p3 = pneg %p1116_p2 }
  0x1d   : > { %p1122_p7 = pnand %p1120_p6, %p1117_p3 }
  0x1f   : > { %1125 = shalt.err (!%p1122_p7)
}
  0x20   : > { %s1126_s8 = scalar_lea.vmem %s129_s26, 4096  ;;  %p1134_p10 = scmp.lt.s32.totalorder %s129_s26, %s129_s26 }
  0x21   : > { %p1127_p9 = scmp.ne.s32.totalorder %s129_s26, %s1126_s8  ;;  %p1135_p8 = scmp.lt.s32.totalorder %s1126_s8, %s1126_s8 }
  0x23   : > { %p1129_p12 = pnand %p1127_p9, %p1115_p1  ;;  %p1136_p11 = por %p1135_p8, %p1134_p10 }
  0x25   : > { %p1130_p5 = pneg %p1129_p12 }
  0x27   : > { %p1137_p4 = pnand %p1136_p11, %p1130_p5 }
  0x29   : > { %1140 = shalt.err (!%p1137_p4)
}
  0x2a   : > { %s1274_s9 = smov 64   ;;  %s1275_s10 = smov 4  }
  0x2b   : > { %969 = dma.hbm_to_vmem [thread:$0]  (!%p1359_p13), %s1502_s1, 4096, %s129_s26, [#allocation5], %s1274_s9, %s1274_s9, %s1275_s10  }
  0x2c   : > { %p847_p0 = scmp.ge.s32.totalorder %s1239_s15, 3 }
  0x2d   : > { %p1513_p2 = scmp.ne.s32.totalorder (!%p847_p0), %s1508_s21, 0 }
  0x2e   : > { %141 = sbr.rel (%p847_p0) target bundleno = 88 (0x58), region = 24 }
  0x35   : > { %144 = sbr.rel (!%p1513_p2) target bundleno = 88 (0x58), region = 28  ;;  %s145_s18 = sand.u32 (%p1513_p2), 1, %s1235_s14  }
  0x36   : > { %s849_s19 = sshll.u32 (%p1513_p2), %s1239_s15, 1  ;;  %s848_s25 = sshll.u32 (%p1513_p2), %s145_s18, 6 }
  0x37   : > { %s151_s28 = ssub.s32 (%p1513_p2), 5, %s849_s19  ;;  %s1387_s30 = scalar_lea.sflag (%p1513_p2), [#allocation3], %s145_s18 }
  0x38   : > { %p152_p4 = scmp.lt.s32.totalorder (%p1513_p2), %s151_s28, 2  ;;  %s149_s26 = scalar_lea.vmem (%p1513_p2), [#allocation2], %s848_s25 }
  0x3c   : > { %s1524_s28 = smov (!%p152_p4, %s151_s28), 2 }
  0x3d   : > { %s1384_s29 = sshll.u32 %s1524_s28, 9 }
  0x3e   : > { %s157_s27 = ssub.s32 1024, %s1384_s29 }
  0x3f   : > { %158 = vsyncadd %s1387_s30, %s157_s27  ;;  %p852_p5 = scmp.ne.s32.totalorder %s1384_s29, 0  ;;  %s913_s21 = sshll.u32 %s1239_s15, 10 }
  0x40   : > { %s1395_s6 = scalar_lea.hbm %s1501_s0, %s913_s21  ;;  %s164_s7 = sshll.u32 %s149_s26, 4  ;;  %s1397_s7 = int_to_ptr.vmem [resolvable:$true] %s164_s7 }
  0x41   : > { %s1141_s8 = scalar_lea.hbm %s1395_s6, %s1384_s29  ;;  %s1145_s15 = scalar_lea.hbm %s1501_s0, 2560 }
  0x42   : > { %p1142_p8 = scmp.ne.s32.totalorder %s1395_s6, %s1141_s8  ;;  %p1146_p13 = scmp.lt.u32.totalorder %s1395_s6, %s1501_s0 }
  0x43   : > { %p1147_p1 = scmp.lt.u32.totalorder %s1145_s15, %s1141_s8  ;;  %p1149_p6 = scmp.lt.u32.totalorder %s1141_s8, %s1395_s6 }
  0x44   : > { %p1143_p10 = pnand %p1142_p8, %p852_p5 }
  0x45   : > { %p1148_p3 = por %p1147_p1, %p1146_p13 }
  0x46   : > { %p1144_p11 = pneg %p1143_p10 }
  0x47   : > { %p1150_p7 = por %p1149_p6, %p1148_p3 }
  0x49   : > { %p1151_p9 = pnand %p1150_p7, %p1144_p11 }
  0x4b   : > { %1154 = shalt.err (!%p1151_p9)
}
  0x4c   : > { %s1155_s18 = scalar_lea.vmem %s1397_s7, %s1384_s29  ;;  %s1276_s19 = smov [#allocation2]  }
  0x4d   : > { %p1156_p12 = scmp.ne.s32.totalorder %s1397_s7, %s1155_s18  ;;  %s1159_s25 = sshll.u32 %s1276_s19, 4  ;;  %s1160_s25 = int_to_ptr.vmem [resolvable:$false] %s1159_s25 }
  0x4e   : > { %s1161_s28 = scalar_lea.vmem %s1160_s25, 2048  ;;  %p1162_p4 = scmp.lt.s32.totalorder %s1397_s7, %s1160_s25 }
  0x4f   : > { %p1157_p0 = pnand %p1156_p12, %p852_p5  ;;  %p1163_p8 = scmp.lt.s32.totalorder %s1161_s28, %s1155_s18 }
  0x51   : > { %p1158_p2 = pneg %p1157_p0  ;;  %p1164_p10 = por %p1163_p8, %p1162_p4 }
  0x53   : > { %p1165_p13 = pnand %p1164_p10, %p1158_p2 }
  0x55   : > { %1168 = shalt.err (!%p1165_p13)
}
  0x56   : > { %s1277_s27 = smov 512   ;;  %s1278_s26 = smov 32  }
  0x57   : > { %170 = dma.hbm_to_vmem [thread:$0]  (%p852_p5), %s1395_s6, %s1384_s29, %s1397_s7, %s1387_s30, %s1277_s27, %s1277_s27, %s1278_s26  }
  0x58 PF: > { %p1514_p11 = scmp.ne.s32.totalorder %s1511_s24, 0 }
  0x59   : > { %s1427_s21 = sand.u32 (!%p1514_p11), 1, %s1231_s13   ;;  %p1515_p1 = scmp.ne.s32.totalorder (!%p1514_p11), %s1509_s22, 0 }
  0x5a   : > { %176 = sbr.rel (%p1514_p11) target bundleno = 582 (0x246), region = 32  ;;  %s858_s4 = sshll.u32 (!%p1514_p11), %s1427_s21, 6 }
  0x5b   : > { %s179_s5 = scalar_lea.sflag (!%p1514_p11), [#allocation3], %s1427_s21  ;;  %s1431_s8 = scalar_lea.vmem (!%p1514_p11), [#allocation2], %s858_s4 }
  0x61   : > { %1218 = dma.done.wait (%p1515_p1), %s179_s5, 1024  }
  0x62   : > { %1220 = vsyncadd (%p1515_p1), %s179_s5, 4294966272  ;;  %p1516_p5 = scmp.eq.s32.totalorder %s1318_s16, 0 }
  0x64   : > { %1222 = dma.done.wait (%p1516_p5), [#allocation5], 4096   ;;  %p1517_p3 = pmov %p1516_p5 }
  0x65   : > { %v1073_v0 = vld [vmem:[#allocation4 + $0x40] sm:$0xff]   ;;  %v1077_v4 = vld [vmem:[#allocation4 + $0x48] sm:$0xff]   ;;  %v1081_v8 = vld [vmem:[#allocation4 + $0x50] sm:$0xff]   ;;  %s860_s29 = sshll.u32 %s1427_s21, 4  ;;  %vm601_vm2 = vcmask 7168   ;;  %p1518_p6 = scmp.ne.s32.totalorder %s1510_s23, 0 }
  0x66   : > { %1224 = vsyncadd (%p1517_p3), [#allocation5], 4294963200  ;;  %v1074_v1 = vld [vmem:[#allocation4 + $0xc0] sm:$0xff]   ;;  %917 = vmatprep.subr.bf16.mxu0 %v1073_v0  ;;  %v1078_v5 = vld [vmem:[#allocation4 + $0xc8] sm:$0xff]   ;;  %s1453_s30 = scalar_lea.vmem [#allocation6], %s860_s29   ;;  %s895_s6 = sshll.u32 (%p1518_p6), %s1318_s16, 1 }
  0x67   : > { %v1075_v2 = vld [vmem:[#allocation4] sm:$0xff]   ;;  %939 = vmatprep.subr.bf16.mxu1 %v1074_v1  ;;  %v1079_v6 = vld [vmem:[#allocation4 + $0x8] sm:$0xff]   ;;  %v1082_v9 = vld [vmem:[#allocation4 + $0xd0] sm:$0xff]   ;;  %s914_s7 = sshll.u32 (%p1518_p6), %s1318_s16, 4  ;;  %s612_s9 = ssub.s32 (%p1518_p6), 5, %s895_s6 }
  0x68   : > { %v1076_v3 = vld [vmem:[#allocation4 + $0x80] sm:$0xff]   ;;  %918 = vmatpush3.bf16.msra.mxu0 %v1075_v2  ;;  %v1080_v7 = vld [vmem:[#allocation4 + $0x88] sm:$0xff]   ;;  %v1083_v10 = vld [vmem:[#allocation4 + $0x10] sm:$0xff]   ;;  %s1464_s11 = scalar_lea.vmem (%p1518_p6), %s1504_s3, %s914_s7   ;;  %p613_p7 = scmp.lt.s32.totalorder (%p1518_p6), %s612_s9, 2 }
  0x69   : > { %940 = vmatpush3.bf16.msra.mxu1 %v1076_v3  ;;  %919 = vmatprep.subr.bf16.mxu0 %v1077_v4  ;;  %v1084_v11 = vld [vmem:[#allocation4 + $0x90] sm:$0xff]   ;;  %v1085_v12 = vld [vmem:[#allocation4 + $0x58] sm:$0xff]   ;;  %v1089_v16 = vld [vmem:[#allocation4 + $0x60] sm:$0xff]  }
  0x6a   : > { %941 = vmatprep.subr.bf16.mxu1 %v1078_v5  ;;  %v1086_v13 = vld [vmem:[#allocation4 + $0xd8] sm:$0xff]   ;;  %v1090_v17 = vld [vmem:[#allocation4 + $0xe0] sm:$0xff]   ;;  %v1093_v20 = vld [vmem:[#allocation4 + $0x68] sm:$0xff]  }
  0x6b   : > { %v1087_v14 = vld [vmem:[#allocation4 + $0x18] sm:$0xff]   ;;  %v1091_v18 = vld [vmem:[#allocation4 + $0x20] sm:$0xff]   ;;  %v1094_v21 = vld [vmem:[#allocation4 + $0xe8] sm:$0xff]  }
  0x6c   : > { %920 = vmatpush3.bf16.msra.mxu0 %v1079_v6  ;;  %v1088_v15 = vld [vmem:[#allocation4 + $0x98] sm:$0xff]   ;;  %v1092_v19 = vld [vmem:[#allocation4 + $0xa0] sm:$0xff]   ;;  %v1095_v22 = vld [vmem:[#allocation4 + $0x28] sm:$0xff]  }
  0x6d   : > { %942 = vmatpush3.bf16.msra.mxu1 %v1080_v7  ;;  %921 = vmatprep.subr.bf16.mxu0 %v1081_v8  ;;  %v1096_v23 = vld [vmem:[#allocation4 + $0xa8] sm:$0xff]   ;;  %v1097_v24 = vld [vmem:[#allocation4 + $0x70] sm:$0xff]   ;;  %v1101_v28 = vld [vmem:[#allocation4 + $0x78] sm:$0xff]  }
  0x6e   : > { %943 = vmatprep.subr.bf16.mxu1 %v1082_v9  ;;  %v1098_v25 = vld [vmem:[#allocation4 + $0xf0] sm:$0xff]   ;;  %v1102_v29 = vld [vmem:[#allocation4 + $0xf8] sm:$0xff]   ;;  %v221_v32 = vld [vmem:[%s1431_s8 + $0x8] sm:$0xff] }
  0x6f   : > { %v1099_v26 = vld [vmem:[#allocation4 + $0x30] sm:$0xff]   ;;  %v1103_v30 = vld [vmem:[#allocation4 + $0x38] sm:$0xff]   ;;  %v225_v33 = vld [vmem:[%s1431_s8 + $0x28] sm:$0xff] }
  0x70   : > { %922 = vmatpush3.bf16.msra.mxu0 %v1083_v10  ;;  %v1100_v27 = vld [vmem:[#allocation4 + $0xb0] sm:$0xff]   ;;  %v1104_v31 = vld [vmem:[#allocation4 + $0xb8] sm:$0xff]   ;;  %v229_v35 = vpack.c.bf16 %v225_v33, %v221_v32  ;;  %v220_v37 = vld [vmem:[%s1431_s8] sm:$0xff] }
  0x71   : > { %944 = vmatpush3.bf16.msra.mxu1 %v1084_v11  ;;  %923 = vmatprep.subr.bf16.mxu0 %v1085_v12  ;;  %v223_v34 = vld [vmem:[%s1431_s8 + $0x18] sm:$0xff]  ;;  %v224_v38 = vld [vmem:[%s1431_s8 + $0x20] sm:$0xff]  ;;  %v222_v41 = vld [vmem:[%s1431_s8 + $0x10] sm:$0xff] }
  0x72   : > { %945 = vmatprep.subr.bf16.mxu1 %v1086_v13  ;;  %v227_v36 = vld [vmem:[%s1431_s8 + $0x38] sm:$0xff]  ;;  %v228_v40 = vpack.c.bf16 %v224_v38, %v220_v37  ;;  %v226_v42 = vld [vmem:[%s1431_s8 + $0x30] sm:$0xff]  ;;  %520 = vmatprep.mubr.bf16.mxu0 %v229_v35 }
  0x73   : > { %v231_v39 = vpack.c.bf16 %v227_v36, %v223_v34  ;;  %v230_v43 = vpack.c.bf16 %v226_v42, %v222_v41  ;;  %v893_v59 = vld [vmem:[%s1503_s2] ss:$0 sm:$0xff] }
  0x74   : > { %924 = vmatpush3.bf16.msra.mxu0 %v1087_v14 }
  0x75   : > { %946 = vmatpush3.bf16.msra.mxu1 %v1088_v15  ;;  %925 = vmatprep.subr.bf16.mxu0 %v1089_v16 }
  0x76   : > { %947 = vmatprep.subr.bf16.mxu1 %v1090_v17  ;;  %561 = vmatprep.mubr.bf16.mxu1 %v231_v39 }
  0x78   : > { %926 = vmatpush3.bf16.msra.mxu0 %v1091_v18 }
  0x79   : > { %948 = vmatpush3.bf16.msra.mxu1 %v1092_v19  ;;  %927 = vmatprep.subr.bf16.mxu0 %v1093_v20 }
  0x7a   : > { %949 = vmatprep.subr.bf16.mxu1 %v1094_v21 }
  0x7c   : > { %928 = vmatpush3.bf16.msra.mxu0 %v1095_v22 }
  0x7d   : > { %950 = vmatpush3.bf16.msra.mxu1 %v1096_v23  ;;  %929 = vmatprep.subr.bf16.mxu0 %v1097_v24 }
  0x7e   : > { %951 = vmatprep.subr.bf16.mxu1 %v1098_v25 }
  0x80   : > { %930 = vmatpush3.bf16.msra.mxu0 %v1099_v26 }
  0x81   : > { %952 = vmatpush3.bf16.msra.mxu1 %v1100_v27  ;;  %931 = vmatprep.subr.bf16.mxu0 %v1101_v28 }
  0x82   : > { %953 = vmatprep.subr.bf16.mxu1 %v1102_v29 }
  0x84   : > { %932 = vmatpush3.bf16.msra.mxu0 %v1103_v30 }
  0x85   : > { %954 = vmatpush3.bf16.msra.mxu1 %v1104_v31 }
  0x87   : > { %521 = vmatmul.mubr.bf16.vlgmr.msra.gmra.mrb[0].mxu0 %v228_v40 }
  0x88   : > { %562 = vmatmul.mubr.bf16.vlgmr.msra.gmra.mrb[0].mxu1 %v230_v43 }
 0x15a   : > { %v933_v44 = vpop.f32.mrb[0].mxu0 }
 0x15b   : > { %v955_v45 = vpop.f32.mrb[0].mxu1  ;;  %v934_v46 = vpop.f32.mrb[1].mxu0 }
 0x15c   : > { %v935_v47 = vadd.f32 %v934_v46, %v933_v44  ;;  %v956_v48 = vpop.f32.mrb[1].mxu1  ;;  %v936_v49 = vpop.f32.mrb[2].mxu0 }
 0x15d   : > { %v957_v50 = vadd.f32 %v956_v48, %v955_v45  ;;  %v958_v51 = vpop.f32.mrb[2].mxu1  ;;  %v937_v52 = vpop.f32.mrb[3].mxu0 }
 0x15e   : > { %v938_v53 = vadd.f32 %v937_v52, %v936_v49  ;;  %v959_v54 = vpop.f32.mrb[3].mxu1 }
 0x15f   : > { %v564_v55 = vadd.f32 %v957_v50, %v935_v47  ;;  %v960_v56 = vadd.f32 %v959_v54, %v958_v51 }
 0x161   : > { %v567_v57 = vadd.f32 %v960_v56, %v938_v53  ;;  %vm570_vm0 = vcmp.gt.f32.partialorder %v564_v55, 0.0  ;;  %v572_v58 = vmul.f32 0.01, %v564_v55 }
 0x163   : > { %v574_v60 = vsel %vm570_vm0, %v564_v55, %v572_v58  ;;  %vm571_vm1 = vcmp.gt.f32.partialorder %v567_v57, 0.0  ;;  %v573_v61 = vmul.f32 0.01, %v567_v57 }
 0x164   : > { %v583_v62 = vmul.f32 %v893_v59, %v574_v60 }
 0x165   : > { %v575_v63 = vsel %vm571_vm1, %v567_v57, %v573_v61 }
 0x166   : > { %585 = vadd.xlane.f32.xlu0 %v583_v62  ;;  %v584_v0 = vmul.f32 %v893_v59, %v575_v63 }
 0x16a   : > { %587 = vadd.xlane.f32.xlu0 %v584_v0 }
 0x1f3   : > { %v586_v1 = vpop.xlane.xlu0 %585 }
 0x1f4   : > { %v589_v2 = vsub.f32 0.0, %v586_v1 }
 0x1f6   : > { %v591_v3 = vmul.f32 1.442695, %v589_v2 }
 0x1f7   : > { %v588_v4 = vpop.xlane.xlu0 %587 }
 0x1f8   : > { %1105 = vpow2.f32 %v591_v3  ;;  %v590_v5 = vsub.f32 0.0, %v588_v4 }
 0x1fa   : > { %v593_v6 = vmul.f32 1.442695, %v590_v5 }
 0x1fc   : > { %1107 = vpow2.f32 %v593_v6 }
 0x202   : > { %v1106_v7 = vpop.eup %1105 }
 0x203   : > { %v595_v8 = vadd.f32 1.0, %v1106_v7 }
 0x205   : > { %1109 = vrcp.f32 %v595_v8 }
 0x206   : > { %v1108_v9 = vpop.eup %1107 }
 0x207   : > { %v596_v10 = vadd.f32 1.0, %v1108_v9 }
 0x209   : > { %1111 = vrcp.f32 %v596_v10 }
 0x20e   : > { %610 = sbr.rel (!%p1518_p6) target bundleno = 582 (0x246), region = 44 }
 0x20f   : > { %v1110_v11 = vpop.eup %1109 }
 0x210   : > { %602 = vst.msk [vmem:[%s1453_s30] sm:$0xff] %vm601_vm2, %v1110_v11 }
 0x213   : > { %v1112_v12 = vpop.eup %1111 }
 0x214   : > { %603 = vst.msk [vmem:[%s1453_s30 + $0x8] sm:$0xff] %vm601_vm2, %v1112_v12 }
 0x215   : > { %s1526_s9 = smov (!%p613_p7, %s612_s9), 2 }
 0x216   : > { %s896_s12 = sshll.u32 %s1526_s9, 7 }
 0x217   : > { %p899_p9 = scmp.eq.s32.totalorder %s896_s12, 0 }
 0x218   : > { %s1470_s23 = sshrl.u32 (!%p899_p9), %s1526_s9, 1 }
 0x219   : > { %621 = sbr.rel (%p899_p9) target bundleno = 582 (0x246), region = 48  ;;  %p900_p12 = scmp.le.s32.totalorder (!%p899_p9), %s1470_s23, 0 }
 0x220   : > { %788 = sbr.rel (%p900_p12) target bundleno = 561 (0x231), region = 130  ;;  %s1241_s16 = smov (!%p900_p12), %s1464_s11  }
 0x221   : > { %s1245_s18 = smov (!%p900_p12), %s1453_s30   ;;  %s1249_s19 = smov (!%p900_p12), 0  }
 0x222   : > { %s1253_s25 = smov (!%p900_p12), 0  }
 0x227 LB: >> { %v685_v13 = vld [vmem:[%s1247_s18] sm:$0xff]  ;;  %v687_v14 = vld [vmem:[%s1247_s18 + $0x8] sm:$0xff]  ;;  %s689_s28 = sadd.s32 1, %s1251_s19  ;;  %s679_s25 = sadd.s32 1, %s1255_s25   ;;  %s1255_s25 = sphi %s1253_s25, %s679_s25   ;;  %s1251_s19 = sphi %s1249_s19, %s1250_s19   ;;  %s1247_s18 = sphi %s1245_s18, %s694_s18   ;;  %s1243_s16 = sphi %s1241_s16, %s695_s16  }
 0x228   : >> { %686 = vst [vmem:[%s1243_s16] sm:$0xff] %v685_v13  ;;  %688 = vst [vmem:[%s1243_s16 + $0x8] sm:$0xff] %v687_v14  ;;  %p690_p0 = scmp.ge.s32.totalorder %s689_s28, %s1470_s23  ;;  %p678_p2 = scmp.ge.s32.totalorder %s679_s25, %s1470_s23 }
 0x22a   : >> { %s1528_s28 = smov (%p690_p0, %s689_s28), 0  ;;  %681 = sbr.rel (!%p678_p2) target bundleno = 551 (0x227), region = 136 }
 0x22b   : >> { %s901_s27 = sshll.u32 %s1528_s28, 4  ;;  %s1250_s19 = smov %s1528_s28  }
 0x22c   : >> { %s694_s18 = scalar_lea.vmem %s1453_s30, %s901_s27 [#allocation6]   ;;  %s695_s16 = scalar_lea.vmem %s1464_s11, %s901_s27  }
 0x231 PF: > { %s1480_s26 = sand.u32 1, %s1526_s9   ;;  %s915_s21 = sshll.u32 %s1470_s23, 4 }
 0x232   : > { %s700_s4 = scalar_lea.vmem %s1453_s30, %s915_s21 [#allocation6]   ;;  %s702_s5 = scalar_lea.vmem %s1464_s11, %s915_s21  }
 0x233   : > { %p906_p4 = scmp.le.s32.totalorder %s1480_s26, 0 }
 0x234   : > { %s1257_s8 = smov (!%p906_p4), %s702_s5   ;;  %s1261_s22 = smov (!%p906_p4), %s700_s4  }
 0x235   : > { %802 = sbr.rel (%p906_p4) target bundleno = 582 (0x246), region = 141  ;;  %s1265_s24 = smov (!%p906_p4), 0  }
 0x236   : > { %s1269_s29 = smov (!%p906_p4), 0  }
 0x23c LB: >> { %v712_v15 = vld [vmem:[%s1263_s22] sm:$0xff]  ;;  %s714_s6 = sadd.s32 1, %s1267_s24  ;;  %s706_s29 = sadd.s32 1, %s1271_s29   ;;  %s1271_s29 = sphi %s1269_s29, %s706_s29   ;;  %s1267_s24 = sphi %s1265_s24, %s1266_s24   ;;  %s1263_s22 = sphi %s1261_s22, %s719_s22   ;;  %s1259_s8 = sphi %s1257_s8, %s720_s8  }
 0x23d   : >> { %713 = vst [vmem:[%s1259_s8] sm:$0xff] %v712_v15  ;;  %p715_p8 = scmp.ge.s32.totalorder %s714_s6, %s1480_s26  ;;  %p705_p10 = scmp.ge.s32.totalorder %s706_s29, %s1480_s26 }
 0x23f   : >> { %s1530_s6 = smov (%p715_p8, %s714_s6), 0  ;;  %708 = sbr.rel (!%p705_p10) target bundleno = 572 (0x23c), region = 147 }
 0x240   : >> { %s907_s30 = sshll.u32 %s1530_s6, 3  ;;  %s1266_s24 = smov %s1530_s6  }
 0x241   : >> { %s719_s22 = scalar_lea.vmem %s700_s4, %s907_s30 [#allocation6]   ;;  %s720_s8 = scalar_lea.vmem %s702_s5, %s907_s30  }
 0x246 PF: > { %p14_p13 = scmp.ge.s32.totalorder %s1321_s17, 5   ;;  %s1519_s12 = smov %s1231_s13 }
 0x247   : > { %s1520_s13 = smov %s1235_s14  ;;  %s1521_s14 = smov %s1331_s20 }
 0x248   : > { %s1522_s15 = smov %s1321_s17  ;;  %16 = sbr.rel (!%p14_p13) target bundleno = 4 (0x4), region = 158 }
 0x24f   :  { %736 = vsyncpa [#allocation3], 1 }
 0x250   :  { %738 = vsyncpa [#allocation3 + $0x1], 1 }
 0x251   :  { %739 = vsyncpa [#allocation5], 1 }

// kernel: tpu_custom_call.1
= control target key start
LH: loop header
LB: loop body
LE: loop exit
PB: predicated region body
PF: predicated region fallthrough
CT: control target
= control target key end

     0   :  { %8 = vsyncpa [#allocation3], 0  ;;  %s1501_s0 = inlined_call_operand.hbm [shape: f32[40,512], index: 0, kind: input, shape index: {}]   ;;  %s1502_s1 = inlined_call_operand.hbm [shape: bf16[512,128], index: 1, kind: input, shape index: {}]   ;;  %s1503_s2 = inlined_call_operand.vmem [shape: f32[1,128], index: 2, kind: input, shape index: {}]   ;;  %s1504_s3 = inlined_call_operand.vmem [shape: f32[40,1], index: 3, kind: output, shape index: {}]  }
   0x1   :  { %10 = vsyncpa [#allocation3 + $0x1], 0 }
   0x2   :  { %11 = vsyncpa [#allocation5], 0  ;;  %s1299_s12 = smov 0   ;;  %s1301_s13 = smov 0  }
   0x3   :  { %s1303_s14 = smov 0   ;;  %s1305_s15 = smov 0  }
   0x4 LB: > { %s1318_s16 = sadd.s32 4294967295, %s1239_s15   ;;  %s1321_s17 = sadd.s32 1, %s1239_s15   ;;  %s1239_s15 = sphi %s1305_s15, %s1522_s15   ;;  %s1235_s14 = sphi %s1303_s14, %s1521_s14   ;;  %s1231_s13 = sphi %s1301_s13, %s1520_s13   ;;  %s1227_s12 = sphi %s1299_s12, %s1519_s12  }
   0x5   : > { %s21_s18 = ssub.s32 %s1239_s15, %s1321_s17  ;;  %s24_s19 = sadd.s32 1, %s1235_s14 }
   0x6   : > { %p22_p0 = scmp.eq.s32.totalorder %s21_s18, 0  ;;  %p31_p1 = scmp.ne.s32.totalorder %s1235_s14, %s1231_s13 }
   0x7   : > { %p32_p2 = scmp.eq.s32.totalorder %s1239_s15, 0  ;;  %p37_p3 = scmp.ne.s32.totalorder %s1231_s13, %s1227_s12 }
   0x8   : > { %s1331_s20 = scalar_select %p22_p0, %s1235_s14, %s24_s19  }
   0x9   : > { %p1333_p4 = por %p32_p2, %p31_p1  ;;  %p1505_p5 = scmp.eq.s32.totalorder %s1318_s16, 0 }
   0xa   : > { %p103_p6 = scmp.eq.s32.totalorder %s1318_s16, 2  ;;  %p845_p7 = scmp.ge.s32.totalorder %s1239_s15, 1 }
   0xb   : > { %s1508_s21 = scalar_select %p1333_p4, 1, 0 }
   0xc   : > { %p1342_p8 = por %p1505_p5, %p37_p3  ;;  %p116_p9 = scmp.lt.s32.totalorder %s1239_s15, 4 }
   0xd   : > { %p1347_p10 = por %p103_p6, %p31_p1  ;;  %s1273_s25 = smov [#allocation4]  }
   0xe   : > { %s1509_s22 = scalar_select %p1342_p8, 1, 0 }
   0xf   : > { %s1510_s23 = scalar_select %p1347_p10, 1, 0 }
  0x10   : > { %p1351_p11 = pnand %p845_p7, %p116_p9  ;;  %s128_s26 = sshll.u32 %s1273_s25, 4  ;;  %s129_s26 = int_to_ptr.vmem [resolvable:$true] %s128_s26 }
  0x11   : > { %s1113_s30 = scalar_lea.hbm %s1502_s1, 4096 }
  0x12   : > { %s1511_s24 = scalar_select %p1351_p11, 1, 0 }
  0x13   : > { %p966_p12 = pneg %p1351_p11  ;;  %p1114_p0 = scmp.ne.s32.totalorder %s1502_s1, %s1113_s30 }
  0x14   : > { %p1120_p6 = scmp.lt.u32.totalorder %s1113_s30, %s1502_s1 }
  0x15   : > { %p1359_p13 = pnand %p966_p12, %p1505_p5 }
  0x17   : > { %p1115_p1 = pneg %p1359_p13 }
  0x19   : > { %p1116_p2 = pnand %p1115_p1, %p1114_p0 }
  0x1b   : > { %p1117_p3 = pneg %p1116_p2 }
  0x1d   : > { %p1122_p7 = pnand %p1120_p6, %p1117_p3 }
  0x1f   : > { %1125 = shalt.err (!%p1122_p7)
}
  0x20   : > { %s1126_s8 = scalar_lea.vmem %s129_s26, 4096  ;;  %p1134_p10 = scmp.lt.s32.totalorder %s129_s26, %s129_s26 }
  0x21   : > { %p1127_p9 = scmp.ne.s32.totalorder %s129_s26, %s1126_s8  ;;  %p1135_p8 = scmp.lt.s32.totalorder %s1126_s8, %s1126_s8 }
  0x23   : > { %p1129_p12 = pnand %p1127_p9, %p1115_p1  ;;  %p1136_p11 = por %p1135_p8, %p1134_p10 }
  0x25   : > { %p1130_p5 = pneg %p1129_p12 }
  0x27   : > { %p1137_p4 = pnand %p1136_p11, %p1130_p5 }
  0x29   : > { %1140 = shalt.err (!%p1137_p4)
}
  0x2a   : > { %s1274_s9 = smov 64   ;;  %s1275_s10 = smov 4  }
  0x2b   : > { %969 = dma.hbm_to_vmem [thread:$0]  (!%p1359_p13), %s1502_s1, 4096, %s129_s26, [#allocation5], %s1274_s9, %s1274_s9, %s1275_s10  }
  0x2c   : > { %p847_p0 = scmp.ge.s32.totalorder %s1239_s15, 3 }
  0x2d   : > { %p1513_p2 = scmp.ne.s32.totalorder (!%p847_p0), %s1508_s21, 0 }
  0x2e   : > { %141 = sbr.rel (%p847_p0) target bundleno = 88 (0x58), region = 24 }
  0x35   : > { %144 = sbr.rel (!%p1513_p2) target bundleno = 88 (0x58), region = 28  ;;  %s145_s18 = sand.u32 (%p1513_p2), 1, %s1235_s14  }
  0x36   : > { %s849_s19 = sshll.u32 (%p1513_p2), %s1239_s15, 1  ;;  %s848_s25 = sshll.u32 (%p1513_p2), %s145_s18, 6 }
  0x37   : > { %s151_s28 = ssub.s32 (%p1513_p2), 5, %s849_s19  ;;  %s1387_s30 = scalar_lea.sflag (%p1513_p2), [#allocation3], %s145_s18 }
  0x38   : > { %p152_p4 = scmp.lt.s32.totalorder (%p1513_p2), %s151_s28, 2  ;;  %s149_s26 = scalar_lea.vmem (%p1513_p2), [#allocation2], %s848_s25 }
  0x3c   : > { %s1524_s28 = smov (!%p152_p4, %s151_s28), 2 }
  0x3d   : > { %s1384_s29 = sshll.u32 %s1524_s28, 9 }
  0x3e   : > { %s157_s27 = ssub.s32 1024, %s1384_s29 }
  0x3f   : > { %158 = vsyncadd %s1387_s30, %s157_s27  ;;  %p852_p5 = scmp.ne.s32.totalorder %s1384_s29, 0  ;;  %s913_s21 = sshll.u32 %s1239_s15, 10 }
  0x40   : > { %s1395_s6 = scalar_lea.hbm %s1501_s0, %s913_s21  ;;  %s164_s7 = sshll.u32 %s149_s26, 4  ;;  %s1397_s7 = int_to_ptr.vmem [resolvable:$true] %s164_s7 }
  0x41   : > { %s1141_s8 = scalar_lea.hbm %s1395_s6, %s1384_s29  ;;  %s1145_s15 = scalar_lea.hbm %s1501_s0, 2560 }
  0x42   : > { %p1142_p8 = scmp.ne.s32.totalorder %s1395_s6, %s1141_s8  ;;  %p1146_p13 = scmp.lt.u32.totalorder %s1395_s6, %s1501_s0 }
  0x43   : > { %p1147_p1 = scmp.lt.u32.totalorder %s1145_s15, %s1141_s8  ;;  %p1149_p6 = scmp.lt.u32.totalorder %s1141_s8, %s1395_s6 }
  0x44   : > { %p1143_p10 = pnand %p1142_p8, %p852_p5 }
  0x45   : > { %p1148_p3 = por %p1147_p1, %p1146_p13 }
  0x46   : > { %p1144_p11 = pneg %p1143_p10 }
  0x47   : > { %p1150_p7 = por %p1149_p6, %p1148_p3 }
  0x49   : > { %p1151_p9 = pnand %p1150_p7, %p1144_p11 }
  0x4b   : > { %1154 = shalt.err (!%p1151_p9)
}
  0x4c   : > { %s1155_s18 = scalar_lea.vmem %s1397_s7, %s1384_s29  ;;  %s1276_s19 = smov [#allocation2]  }
  0x4d   : > { %p1156_p12 = scmp.ne.s32.totalorder %s1397_s7, %s1155_s18  ;;  %s1159_s25 = sshll.u32 %s1276_s19, 4  ;;  %s1160_s25 = int_to_ptr.vmem [resolvable:$false] %s1159_s25 }
  0x4e   : > { %s1161_s28 = scalar_lea.vmem %s1160_s25, 2048  ;;  %p1162_p4 = scmp.lt.s32.totalorder %s1397_s7, %s1160_s25 }
  0x4f   : > { %p1157_p0 = pnand %p1156_p12, %p852_p5  ;;  %p1163_p8 = scmp.lt.s32.totalorder %s1161_s28, %s1155_s18 }
  0x51   : > { %p1158_p2 = pneg %p1157_p0  ;;  %p1164_p10 = por %p1163_p8, %p1162_p4 }
  0x53   : > { %p1165_p13 = pnand %p1164_p10, %p1158_p2 }
  0x55   : > { %1168 = shalt.err (!%p1165_p13)
}
  0x56   : > { %s1277_s27 = smov 512   ;;  %s1278_s26 = smov 32  }
  0x57   : > { %170 = dma.hbm_to_vmem [thread:$0]  (%p852_p5), %s1395_s6, %s1384_s29, %s1397_s7, %s1387_s30, %s1277_s27, %s1277_s27, %s1278_s26  }
  0x58 PF: > { %p1514_p11 = scmp.ne.s32.totalorder %s1511_s24, 0 }
  0x59   : > { %s1427_s21 = sand.u32 (!%p1514_p11), 1, %s1231_s13   ;;  %p1515_p1 = scmp.ne.s32.totalorder (!%p1514_p11), %s1509_s22, 0 }
  0x5a   : > { %176 = sbr.rel (%p1514_p11) target bundleno = 582 (0x246), region = 32  ;;  %s858_s4 = sshll.u32 (!%p1514_p11), %s1427_s21, 6 }
  0x5b   : > { %s179_s5 = scalar_lea.sflag (!%p1514_p11), [#allocation3], %s1427_s21  ;;  %s1431_s8 = scalar_lea.vmem (!%p1514_p11), [#allocation2], %s858_s4 }
  0x61   : > { %1218 = dma.done.wait (%p1515_p1), %s179_s5, 1024  }
  0x62   : > { %1220 = vsyncadd (%p1515_p1), %s179_s5, 4294966272  ;;  %p1516_p5 = scmp.eq.s32.totalorder %s1318_s16, 0 }
  0x64   : > { %1222 = dma.done.wait (%p1516_p5), [#allocation5], 4096   ;;  %p1517_p3 = pmov %p1516_p5 }
  0x65   : > { %v1073_v0 = vld [vmem:[#allocation4 + $0x40] sm:$0xff]   ;;  %v1077_v4 = vld [vmem:[#allocation4 + $0x48] sm:$0xff]   ;;  %v1081_v8 = vld [vmem:[#allocation4 + $0x50] sm:$0xff]   ;;  %s860_s29 = sshll.u32 %s1427_s21, 4  ;;  %vm601_vm2 = vcmask 7168   ;;  %p1518_p6 = scmp.ne.s32.totalorder %s1510_s23, 0 }
  0x66   : > { %1224 = vsyncadd (%p1517_p3), [#allocation5], 4294963200  ;;  %v1074_v1 = vld [vmem:[#allocation4 + $0xc0] sm:$0xff]   ;;  %917 = vmatprep.subr.bf16.mxu0 %v1073_v0  ;;  %v1078_v5 = vld [vmem:[#allocation4 + $0xc8] sm:$0xff]   ;;  %s1453_s30 = scalar_lea.vmem [#allocation6], %s860_s29   ;;  %s895_s6 = sshll.u32 (%p1518_p6), %s1318_s16, 1 }
  0x67   : > { %v1075_v2 = vld [vmem:[#allocation4] sm:$0xff]   ;;  %939 = vmatprep.subr.bf16.mxu1 %v1074_v1  ;;  %v1079_v6 = vld [vmem:[#allocation4 + $0x8] sm:$0xff]   ;;  %v1082_v9 = vld [vmem:[#allocation4 + $0xd0] sm:$0xff]   ;;  %s914_s7 = sshll.u32 (%p1518_p6), %s1318_s16, 4  ;;  %s612_s9 = ssub.s32 (%p1518_p6), 5, %s895_s6 }
  0x68   : > { %v1076_v3 = vld [vmem:[#allocation4 + $0x80] sm:$0xff]   ;;  %918 = vmatpush3.bf16.msra.mxu0 %v1075_v2  ;;  %v1080_v7 = vld [vmem:[#allocation4 + $0x88] sm:$0xff]   ;;  %v1083_v10 = vld [vmem:[#allocation4 + $0x10] sm:$0xff]   ;;  %s1464_s11 = scalar_lea.vmem (%p1518_p6), %s1504_s3, %s914_s7   ;;  %p613_p7 = scmp.lt.s32.totalorder (%p1518_p6), %s612_s9, 2 }
  0x69   : > { %940 = vmatpush3.bf16.msra.mxu1 %v1076_v3  ;;  %919 = vmatprep.subr.bf16.mxu0 %v1077_v4  ;;  %v1084_v11 = vld [vmem:[#allocation4 + $0x90] sm:$0xff]   ;;  %v1085_v12 = vld [vmem:[#allocation4 + $0x58] sm:$0xff]   ;;  %v1089_v16 = vld [vmem:[#allocation4 + $0x60] sm:$0xff]  }
  0x6a   : > { %941 = vmatprep.subr.bf16.mxu1 %v1078_v5  ;;  %v1086_v13 = vld [vmem:[#allocation4 + $0xd8] sm:$0xff]   ;;  %v1090_v17 = vld [vmem:[#allocation4 + $0xe0] sm:$0xff]   ;;  %v1093_v20 = vld [vmem:[#allocation4 + $0x68] sm:$0xff]  }
  0x6b   : > { %v1087_v14 = vld [vmem:[#allocation4 + $0x18] sm:$0xff]   ;;  %v1091_v18 = vld [vmem:[#allocation4 + $0x20] sm:$0xff]   ;;  %v1094_v21 = vld [vmem:[#allocation4 + $0xe8] sm:$0xff]  }
  0x6c   : > { %920 = vmatpush3.bf16.msra.mxu0 %v1079_v6  ;;  %v1088_v15 = vld [vmem:[#allocation4 + $0x98] sm:$0xff]   ;;  %v1092_v19 = vld [vmem:[#allocation4 + $0xa0] sm:$0xff]   ;;  %v1095_v22 = vld [vmem:[#allocation4 + $0x28] sm:$0xff]  }
  0x6d   : > { %942 = vmatpush3.bf16.msra.mxu1 %v1080_v7  ;;  %921 = vmatprep.subr.bf16.mxu0 %v1081_v8  ;;  %v1096_v23 = vld [vmem:[#allocation4 + $0xa8] sm:$0xff]   ;;  %v1097_v24 = vld [vmem:[#allocation4 + $0x70] sm:$0xff]   ;;  %v1101_v28 = vld [vmem:[#allocation4 + $0x78] sm:$0xff]  }
  0x6e   : > { %943 = vmatprep.subr.bf16.mxu1 %v1082_v9  ;;  %v1098_v25 = vld [vmem:[#allocation4 + $0xf0] sm:$0xff]   ;;  %v1102_v29 = vld [vmem:[#allocation4 + $0xf8] sm:$0xff]   ;;  %v221_v32 = vld [vmem:[%s1431_s8 + $0x8] sm:$0xff] }
  0x6f   : > { %v1099_v26 = vld [vmem:[#allocation4 + $0x30] sm:$0xff]   ;;  %v1103_v30 = vld [vmem:[#allocation4 + $0x38] sm:$0xff]   ;;  %v225_v33 = vld [vmem:[%s1431_s8 + $0x28] sm:$0xff] }
  0x70   : > { %922 = vmatpush3.bf16.msra.mxu0 %v1083_v10  ;;  %v1100_v27 = vld [vmem:[#allocation4 + $0xb0] sm:$0xff]   ;;  %v1104_v31 = vld [vmem:[#allocation4 + $0xb8] sm:$0xff]   ;;  %v229_v35 = vpack.c.bf16 %v225_v33, %v221_v32  ;;  %v220_v37 = vld [vmem:[%s1431_s8] sm:$0xff] }
  0x71   : > { %944 = vmatpush3.bf16.msra.mxu1 %v1084_v11  ;;  %923 = vmatprep.subr.bf16.mxu0 %v1085_v12  ;;  %v223_v34 = vld [vmem:[%s1431_s8 + $0x18] sm:$0xff]  ;;  %v224_v38 = vld [vmem:[%s1431_s8 + $0x20] sm:$0xff]  ;;  %v222_v41 = vld [vmem:[%s1431_s8 + $0x10] sm:$0xff] }
  0x72   : > { %945 = vmatprep.subr.bf16.mxu1 %v1086_v13  ;;  %v227_v36 = vld [vmem:[%s1431_s8 + $0x38] sm:$0xff]  ;;  %v228_v40 = vpack.c.bf16 %v224_v38, %v220_v37  ;;  %v226_v42 = vld [vmem:[%s1431_s8 + $0x30] sm:$0xff]  ;;  %520 = vmatprep.mubr.bf16.mxu0 %v229_v35 }
  0x73   : > { %v231_v39 = vpack.c.bf16 %v227_v36, %v223_v34  ;;  %v230_v43 = vpack.c.bf16 %v226_v42, %v222_v41  ;;  %v893_v59 = vld [vmem:[%s1503_s2] ss:$0 sm:$0xff] }
  0x74   : > { %924 = vmatpush3.bf16.msra.mxu0 %v1087_v14 }
  0x75   : > { %946 = vmatpush3.bf16.msra.mxu1 %v1088_v15  ;;  %925 = vmatprep.subr.bf16.mxu0 %v1089_v16 }
  0x76   : > { %947 = vmatprep.subr.bf16.mxu1 %v1090_v17  ;;  %561 = vmatprep.mubr.bf16.mxu1 %v231_v39 }
  0x78   : > { %926 = vmatpush3.bf16.msra.mxu0 %v1091_v18 }
  0x79   : > { %948 = vmatpush3.bf16.msra.mxu1 %v1092_v19  ;;  %927 = vmatprep.subr.bf16.mxu0 %v1093_v20 }
  0x7a   : > { %949 = vmatprep.subr.bf16.mxu1 %v1094_v21 }
  0x7c   : > { %928 = vmatpush3.bf16.msra.mxu0 %v1095_v22 }
  0x7d   : > { %950 = vmatpush3.bf16.msra.mxu1 %v1096_v23  ;;  %929 = vmatprep.subr.bf16.mxu0 %v1097_v24 }
  0x7e   : > { %951 = vmatprep.subr.bf16.mxu1 %v1098_v25 }
  0x80   : > { %930 = vmatpush3.bf16.msra.mxu0 %v1099_v26 }
  0x81   : > { %952 = vmatpush3.bf16.msra.mxu1 %v1100_v27  ;;  %931 = vmatprep.subr.bf16.mxu0 %v1101_v28 }
  0x82   : > { %953 = vmatprep.subr.bf16.mxu1 %v1102_v29 }
  0x84   : > { %932 = vmatpush3.bf16.msra.mxu0 %v1103_v30 }
  0x85   : > { %954 = vmatpush3.bf16.msra.mxu1 %v1104_v31 }
  0x87   : > { %521 = vmatmul.mubr.bf16.vlgmr.msra.gmra.mrb[0].mxu0 %v228_v40 }
  0x88   : > { %562 = vmatmul.mubr.bf16.vlgmr.msra.gmra.mrb[0].mxu1 %v230_v43 }
 0x15a   : > { %v933_v44 = vpop.f32.mrb[0].mxu0 }
 0x15b   : > { %v955_v45 = vpop.f32.mrb[0].mxu1  ;;  %v934_v46 = vpop.f32.mrb[1].mxu0 }
 0x15c   : > { %v935_v47 = vadd.f32 %v934_v46, %v933_v44  ;;  %v956_v48 = vpop.f32.mrb[1].mxu1  ;;  %v936_v49 = vpop.f32.mrb[2].mxu0 }
 0x15d   : > { %v957_v50 = vadd.f32 %v956_v48, %v955_v45  ;;  %v958_v51 = vpop.f32.mrb[2].mxu1  ;;  %v937_v52 = vpop.f32.mrb[3].mxu0 }
 0x15e   : > { %v938_v53 = vadd.f32 %v937_v52, %v936_v49  ;;  %v959_v54 = vpop.f32.mrb[3].mxu1 }
 0x15f   : > { %v564_v55 = vadd.f32 %v957_v50, %v935_v47  ;;  %v960_v56 = vadd.f32 %v959_v54, %v958_v51 }
 0x161   : > { %v567_v57 = vadd.f32 %v960_v56, %v938_v53  ;;  %vm570_vm0 = vcmp.gt.f32.partialorder %v564_v55, 0.0  ;;  %v572_v58 = vmul.f32 0.01, %v564_v55 }
 0x163   : > { %v574_v60 = vsel %vm570_vm0, %v564_v55, %v572_v58  ;;  %vm571_vm1 = vcmp.gt.f32.partialorder %v567_v57, 0.0  ;;  %v573_v61 = vmul.f32 0.01, %v567_v57 }
 0x164   : > { %v583_v62 = vmul.f32 %v893_v59, %v574_v60 }
 0x165   : > { %v575_v63 = vsel %vm571_vm1, %v567_v57, %v573_v61 }
 0x166   : > { %585 = vadd.xlane.f32.xlu0 %v583_v62  ;;  %v584_v0 = vmul.f32 %v893_v59, %v575_v63 }
 0x16a   : > { %587 = vadd.xlane.f32.xlu0 %v584_v0 }
 0x1f3   : > { %v586_v1 = vpop.xlane.xlu0 %585 }
 0x1f4   : > { %v589_v2 = vsub.f32 0.0, %v586_v1 }
 0x1f6   : > { %v591_v3 = vmul.f32 1.442695, %v589_v2 }
 0x1f7   : > { %v588_v4 = vpop.xlane.xlu0 %587 }
 0x1f8   : > { %1105 = vpow2.f32 %v591_v3  ;;  %v590_v5 = vsub.f32 0.0, %v588_v4 }
 0x1fa   : > { %v593_v6 = vmul.f32 1.442695, %v590_v5 }
 0x1fc   : > { %1107 = vpow2.f32 %v593_v6 }
 0x202   : > { %v1106_v7 = vpop.eup %1105 }
 0x203   : > { %v595_v8 = vadd.f32 1.0, %v1106_v7 }
 0x205   : > { %1109 = vrcp.f32 %v595_v8 }
 0x206   : > { %v1108_v9 = vpop.eup %1107 }
 0x207   : > { %v596_v10 = vadd.f32 1.0, %v1108_v9 }
 0x209   : > { %1111 = vrcp.f32 %v596_v10 }
 0x20e   : > { %610 = sbr.rel (!%p1518_p6) target bundleno = 582 (0x246), region = 44 }
 0x20f   : > { %v1110_v11 = vpop.eup %1109 }
 0x210   : > { %602 = vst.msk [vmem:[%s1453_s30] sm:$0xff] %vm601_vm2, %v1110_v11 }
 0x213   : > { %v1112_v12 = vpop.eup %1111 }
 0x214   : > { %603 = vst.msk [vmem:[%s1453_s30 + $0x8] sm:$0xff] %vm601_vm2, %v1112_v12 }
 0x215   : > { %s1526_s9 = smov (!%p613_p7, %s612_s9), 2 }
 0x216   : > { %s896_s12 = sshll.u32 %s1526_s9, 7 }
 0x217   : > { %p899_p9 = scmp.eq.s32.totalorder %s896_s12, 0 }
 0x218   : > { %s1470_s23 = sshrl.u32 (!%p899_p9), %s1526_s9, 1 }
 0x219   : > { %621 = sbr.rel (%p899_p9) target bundleno = 582 (0x246), region = 48  ;;  %p900_p12 = scmp.le.s32.totalorder (!%p899_p9), %s1470_s23, 0 }
 0x220   : > { %788 = sbr.rel (%p900_p12) target bundleno = 561 (0x231), region = 130  ;;  %s1241_s16 = smov (!%p900_p12), %s1464_s11  }
 0x221   : > { %s1245_s18 = smov (!%p900_p12), %s1453_s30   ;;  %s1249_s19 = smov (!%p900_p12), 0  }
 0x222   : > { %s1253_s25 = smov (!%p900_p12), 0  }
 0x227 LB: >> { %v685_v13 = vld [vmem:[%s1247_s18] sm:$0xff]  ;;  %v687_v14 = vld [vmem:[%s1247_s18 + $0x8] sm:$0xff]  ;;  %s689_s28 = sadd.s32 1, %s1251_s19  ;;  %s679_s25 = sadd.s32 1, %s1255_s25   ;;  %s1255_s25 = sphi %s1253_s25, %s679_s25   ;;  %s1251_s19 = sphi %s1249_s19, %s1250_s19   ;;  %s1247_s18 = sphi %s1245_s18, %s694_s18   ;;  %s1243_s16 = sphi %s1241_s16, %s695_s16  }
 0x228   : >> { %686 = vst [vmem:[%s1243_s16] sm:$0xff] %v685_v13  ;;  %688 = vst [vmem:[%s1243_s16 + $0x8] sm:$0xff] %v687_v14  ;;  %p690_p0 = scmp.ge.s32.totalorder %s689_s28, %s1470_s23  ;;  %p678_p2 = scmp.ge.s32.totalorder %s679_s25, %s1470_s23 }
 0x22a   : >> { %s1528_s28 = smov (%p690_p0, %s689_s28), 0  ;;  %681 = sbr.rel (!%p678_p2) target bundleno = 551 (0x227), region = 136 }
 0x22b   : >> { %s901_s27 = sshll.u32 %s1528_s28, 4  ;;  %s1250_s19 = smov %s1528_s28  }
 0x22c   : >> { %s694_s18 = scalar_lea.vmem %s1453_s30, %s901_s27 [#allocation6]   ;;  %s695_s16 = scalar_lea.vmem %s1464_s11, %s901_s27  }
 0x231 PF: > { %s1480_s26 = sand.u32 1, %s1526_s9   ;;  %s915_s21 = sshll.u32 %s1470_s23, 4 }
 0x232   : > { %s700_s4 = scalar_lea.vmem %s1453_s30, %s915_s21 [#allocation6]   ;;  %s702_s5 = scalar_lea.vmem %s1464_s11, %s915_s21  }
 0x233   : > { %p906_p4 = scmp.le.s32.totalorder %s1480_s26, 0 }
 0x234   : > { %s1257_s8 = smov (!%p906_p4), %s702_s5   ;;  %s1261_s22 = smov (!%p906_p4), %s700_s4  }
 0x235   : > { %802 = sbr.rel (%p906_p4) target bundleno = 582 (0x246), region = 141  ;;  %s1265_s24 = smov (!%p906_p4), 0  }
 0x236   : > { %s1269_s29 = smov (!%p906_p4), 0  }
 0x23c LB: >> { %v712_v15 = vld [vmem:[%s1263_s22] sm:$0xff]  ;;  %s714_s6 = sadd.s32 1, %s1267_s24  ;;  %s706_s29 = sadd.s32 1, %s1271_s29   ;;  %s1271_s29 = sphi %s1269_s29, %s706_s29   ;;  %s1267_s24 = sphi %s1265_s24, %s1266_s24   ;;  %s1263_s22 = sphi %s1261_s22, %s719_s22   ;;  %s1259_s8 = sphi %s1257_s8, %s720_s8  }
 0x23d   : >> { %713 = vst [vmem:[%s1259_s8] sm:$0xff] %v712_v15  ;;  %p715_p8 = scmp.ge.s32.totalorder %s714_s6, %s1480_s26  ;;  %p705_p10 = scmp.ge.s32.totalorder %s706_s29, %s1480_s26 }
 0x23f   : >> { %s1530_s6 = smov (%p715_p8, %s714_s6), 0  ;;  %708 = sbr.rel (!%p705_p10) target bundleno = 572 (0x23c), region = 147 }
 0x240   : >> { %s907_s30 = sshll.u32 %s1530_s6, 3  ;;  %s1266_s24 = smov %s1530_s6  }
 0x241   : >> { %s719_s22 = scalar_lea.vmem %s700_s4, %s907_s30 [#allocation6]   ;;  %s720_s8 = scalar_lea.vmem %s702_s5, %s907_s30  }
 0x246 PF: > { %p14_p13 = scmp.ge.s32.totalorder %s1321_s17, 5   ;;  %s1519_s12 = smov %s1231_s13 }
 0x247   : > { %s1520_s13 = smov %s1235_s14  ;;  %s1521_s14 = smov %s1331_s20 }
 0x248   : > { %s1522_s15 = smov %s1321_s17  ;;  %16 = sbr.rel (!%p14_p13) target bundleno = 4 (0x4), region = 158 }
 0x24f   :  { %736 = vsyncpa [#allocation3], 1 }
 0x250   :  { %738 = vsyncpa [#allocation3 + $0x1], 1 }
 0x251   :  { %739 = vsyncpa [#allocation5], 1 }

</bundles_post_ra>
